<compile_context>
chip_gen: v5e
topology: v5e:2x2
jax: 0.10.0
libtpu: 0.0.40
codegen_flags: <defaults>
</compile_context>

<pallas_src>
from functools import partial
from math import sqrt

import jax
import jax.numpy as jnp
from jax.experimental import pallas as pl
from jax.experimental.pallas import tpu as pltpu


def _round_up(x, m):
    return ((x + m - 1) // m) * m


def fuse_qkv_params(wq, bq, wk, bk, wv, bv):
    """One-time parameter prep (module-init time).

    Pads the Q/K projection widths to a lane-dense multiple of 128, fuses
    Q|K|V into one (Din, Nf) weight, and casts the weight to bf16 (MXU operand
    dtype).  The bias stays f32 -- it is added to the f32 accumulator.
    Zero-padded Q/K columns (weight AND bias are zero) contribute nothing to
    Q @ K^T, so semantics are unchanged.
    """
    dk = wq.shape[1]
    dkp = _round_up(dk, 128)

    def pad_k(a):
        return jnp.pad(a, ((0, 0), (0, dkp - dk)))

    w_qkv = jnp.concatenate([pad_k(wq), pad_k(wk), wv], axis=1).astype(jnp.bfloat16)
    b_qkv = jnp.concatenate([pad_k(bq), pad_k(bk), bv], axis=1).astype(jnp.float32)
    return w_qkv, b_qkv, dkp


def _attention_kernel(x_ref, w_ref, b_ref, o_ref, *, norm_fact, dkp, dv):
    bb, s, din = x_ref.shape

    # ---- fused QKV projection: one wide MXU matmul over all Bb*S rows -------
    x = x_ref[...].reshape(bb * s, din).astype(jnp.bfloat16)
    qkv = jnp.dot(x, w_ref[...], preferred_element_type=jnp.float32) + b_ref[...]

    q = qkv[:, :dkp].reshape(bb, s, dkp)            # lane-aligned static slices
    k = qkv[:, dkp:2 * dkp].reshape(bb, s, dkp)
    v = qkv[:, 2 * dkp:].reshape(bb, s, dv)

    # ---- scores = Q @ K^T (contract last axes, batched; no explicit transpose)
    scores = jnp.einsum(
        "bqd,bkd->bqk",
        q.astype(jnp.bfloat16), k.astype(jnp.bfloat16),
        preferred_element_type=jnp.float32,
    )

    # ---- numerically stable softmax in f32; the post-softmax 1/sqrt(dim_k)
    # scale (matching the PyTorch reference exactly) is folded into the
    # per-row reciprocal.  Exact reciprocal (approx EUP recip was a
    # correctness risk flagged by review).
    scores = scores - jnp.max(scores, axis=-1, keepdims=True)
    e = jnp.exp(scores)
    inv = (1.0 / jnp.sum(e, axis=-1, keepdims=True)) * norm_fact
    atten = e * inv

    # ---- output = atten @ V, stored directly at (Bb, S, dim_v) --------------
    out = jnp.einsum(
        "bqk,bkd->bqd",
        atten.astype(jnp.bfloat16), v.astype(jnp.bfloat16),
        preferred_element_type=jnp.float32,
    )
    o_ref[...] = out.astype(o_ref.dtype)


def _pick_batch_block(batch, seq, din, dkp, dv, vmem_budget=24 << 20):
    """Largest divisor of `batch` whose per-step working set fits a conservative
    VMEM budget (safe on v5e/v6e/v7x default scoped VMEM); prefer >=2 grid
    steps (v7x has 2 TensorCores) when that does not drop the per-step MXU
    tile below ~256 rows."""
    nf = 2 * dkp + dv

    def step_bytes(bb):
        rows = bb * seq
        return (2 * rows * din * 4            # x block (double-buffered)
                + rows * nf * 4               # qkv accumulator
                + 3 * bb * seq * seq * 4      # scores / exp / atten
                + 2 * rows * dv * 4)          # output block (double-buffered)

    divisors = [d for d in range(1, batch + 1) if batch % d == 0]
    bb = 1
    for d in divisors:
        if step_bytes(d) <= vmem_budget:
            bb = d
    if batch // bb == 1:  # try to feed both v7x TensorCores without starving MXU
        for d in reversed(divisors):
            if d < bb and d * seq >= 256:
                bb = d
                break
    return bb


def self_attention_pallas(x, w_qkv, b_qkv, dkp, dim_k, dim_v):
    """
    x      : (B, S, Din) float32
    w_qkv  : (Din, 2*dkp + dim_v) bfloat16   (pre-fused by fuse_qkv_params)
    b_qkv  : (1,   2*dkp + dim_v) float32
    returns: (B, S, dim_v) float32
    """
    B, S, Din = x.shape
    Nf = w_qkv.shape[1]
    assert Nf == 2 * dkp + dim_v
    norm_fact = 1.0 / sqrt(dim_k)

    Bb = _pick_batch_block(B, S, Din, dkp, dim_v)
    grid = (B // Bb,)

    kernel = partial(_attention_kernel, norm_fact=norm_fact, dkp=dkp, dv=dim_v)

    return pl.pallas_call(
        kernel,
        out_shape=jax.ShapeDtypeStruct((B, S, dim_v), x.dtype),
        grid_spec=pltpu.PrefetchScalarGridSpec(
            num_scalar_prefetch=0,
            grid=grid,
            in_specs=[
                pl.BlockSpec((Bb, S, Din), lambda i: (i, 0, 0)),      # x batch-block
                # grid-invariant weight/bias -> single-buffered (no wasted VMEM copy)
                pl.BlockSpec((Din, Nf), lambda i: (0, 0),
                             pipeline_mode=pl.Buffered(1)),
                pl.BlockSpec((1, Nf), lambda i: (0, 0),
                             pipeline_mode=pl.Buffered(1)),
            ],
            out_specs=pl.BlockSpec((Bb, S, dim_v), lambda i: (i, 0, 0)),
        ),
        compiler_params=pltpu.CompilerParams(
            dimension_semantics=("parallel",),
        ),
    )(x, w_qkv, b_qkv)


if __name__ == "__main__":
    # Small shapes consistent with the module: batch * seq_len * input_dim
    B, S, INPUT_DIM, DIM_K, DIM_V = 2, 8, 32, 32, 32

    key = jax.random.PRNGKey(0)
    kx, kwq, kbq, kwk, kbk, kwv, kbv = jax.random.split(key, 7)

    x = jax.random.normal(kx, (B, S, INPUT_DIM), dtype=jnp.float32)

    # Deterministic params (uniform, like nn.Linear's default range), stored
    # pre-transposed as (in_dim, out_dim).
    bound = 1.0 / sqrt(INPUT_DIM)
    wq = jax.random.uniform(kwq, (INPUT_DIM, DIM_K), jnp.float32, -bound, bound)
    bq = jax.random.uniform(kbq, (1, DIM_K), jnp.float32, -bound, bound)
    wk = jax.random.uniform(kwk, (INPUT_DIM, DIM_K), jnp.float32, -bound, bound)
    bk = jax.random.uniform(kbk, (1, DIM_K), jnp.float32, -bound, bound)
    wv = jax.random.uniform(kwv, (INPUT_DIM, DIM_V), jnp.float32, -bound, bound)
    bv = jax.random.uniform(kbv, (1, DIM_V), jnp.float32, -bound, bound)

    # One-time parameter fusion (module-init time, not per forward call).
    w_qkv, b_qkv, dkp = fuse_qkv_params(wq, bq, wk, bk, wv, bv)

    out = self_attention_pallas(x, w_qkv, b_qkv, dkp, DIM_K, DIM_V)
    out = jax.block_until_ready(out)

    # Pure-JAX f32 reference (same math as the PyTorch forward).
    def ref(x):
        Q = x @ wq + bq
        K = x @ wk + bk
        V = x @ wv + bv
        scores = jnp.einsum("bsd,btd->bst", Q, K)
        atten = jax.nn.softmax(scores, axis=-1) * (1.0 / sqrt(DIM_K))
        return jnp.einsum("bst,btd->bsd", atten, V)

    expected = ref(x)
    assert out.shape == (B, S, DIM_V)
    # Tolerance reflects bf16 MXU operands (weights/activations cast to bf16 for
    # the matmuls); accumulation and softmax stay f32, reciprocal is exact.
    max_err = float(jnp.max(jnp.abs(out - expected)))
    assert jnp.allclose(out, expected, atol=2e-2, rtol=2e-2), f"max abs err {max_err}"

    print("KERNEL_OK")
</pallas_src>

<mosaic_0001>
module attributes {stable_mosaic.version = 11 : i64} {
  func.func @_attention_kernel(%arg0: i32, %arg1: memref<2x8x32xf32, #tpu.memory_space<vmem>>, %arg2: memref<32x288xbf16, #tpu.memory_space<vmem>>, %arg3: memref<1x288xf32, #tpu.memory_space<vmem>>, %arg4: memref<2x8x32xf32, #tpu.memory_space<vmem>>) attributes {dimension_semantics = [#tpu.dimension_semantics<parallel>], iteration_bounds = array<i64: 1>, scalar_prefetch = 0 : i64, scratch_operands = 0 : i64, tpu.core_type = #tpu.core_type<tc>, window_params = [{transform_indices = @transform_0, window_bounds = array<i64: 2, 8, 32>}, {pipeline_mode = #tpu.pipeline_mode<synchronous>, transform_indices = @transform_1, window_bounds = array<i64: 32, 288>}, {pipeline_mode = #tpu.pipeline_mode<synchronous>, transform_indices = @transform_2, window_bounds = array<i64: 1, 288>}, {transform_indices = @transform_3, window_bounds = array<i64: 2, 8, 32>}]} {
    %c0 = arith.constant 0 : index
    %c0_0 = arith.constant 0 : index
    %c0_1 = arith.constant 0 : index
    %0 = vector.load %arg1[%c0, %c0_0, %c0_1] : memref<2x8x32xf32, #tpu.memory_space<vmem>>, vector<2x8x32xf32>
    %1 = vector.shape_cast %0 : vector<2x8x32xf32> to vector<16x32xf32>
    %2 = arith.truncf %1 : vector<16x32xf32> to vector<16x32xbf16>
    %c0_2 = arith.constant 0 : index
    %c0_3 = arith.constant 0 : index
    %3 = vector.load %arg2[%c0_2, %c0_3] : memref<32x288xbf16, #tpu.memory_space<vmem>>, vector<32x288xbf16>
    %cst = arith.constant dense<0.000000e+00> : vector<16x288xf32>
    %4 = tpu.matmul %2, %3, %cst {dimension_numbers = #tpu.dot_dimension_numbers<[1], [0], [0], [1], [0, 0, 1, 1], [], []>} : vector<16x32xbf16>, vector<32x288xbf16>, vector<16x288xf32> -> vector<16x288xf32>
    %c0_4 = arith.constant 0 : index
    %c0_5 = arith.constant 0 : index
    %5 = vector.load %arg3[%c0_4, %c0_5] : memref<1x288xf32, #tpu.memory_space<vmem>>, vector<1x288xf32>
    %6 = vector.broadcast %5 : vector<1x288xf32> to vector<16x288xf32>
    %7 = arith.addf %4, %6 : vector<16x288xf32>
    %8 = vector.extract_strided_slice %7 {offsets = [0, 0], sizes = [16, 128], strides = [1, 1]} : vector<16x288xf32> to vector<16x128xf32>
    %9 = vector.shape_cast %8 : vector<16x128xf32> to vector<2x8x128xf32>
    %10 = vector.extract_strided_slice %7 {offsets = [0, 128], sizes = [16, 128], strides = [1, 1]} : vector<16x288xf32> to vector<16x128xf32>
    %11 = vector.shape_cast %10 : vector<16x128xf32> to vector<2x8x128xf32>
    %12 = vector.extract_strided_slice %7 {offsets = [0, 256], sizes = [16, 32], strides = [1, 1]} : vector<16x288xf32> to vector<16x32xf32>
    %13 = vector.shape_cast %12 : vector<16x32xf32> to vector<2x8x32xf32>
    %14 = arith.truncf %9 : vector<2x8x128xf32> to vector<2x8x128xbf16>
    %15 = arith.truncf %11 : vector<2x8x128xf32> to vector<2x8x128xbf16>
    "tpu.trace_start"() <{level = 10 : i32, message = "bqd,bkd->bqk"}> : () -> ()
    %cst_6 = arith.constant dense<0.000000e+00> : vector<2x8x8xf32>
    %16 = tpu.matmul %14, %15, %cst_6 {dimension_numbers = #tpu.dot_dimension_numbers<[2], [2], [1], [1], [0, 0, 0, 1, 1, 1], [0], [0]>} : vector<2x8x128xbf16>, vector<2x8x128xbf16>, vector<2x8x8xf32> -> vector<2x8x8xf32>
    "tpu.trace_stop"() : () -> ()
    %cst_7 = arith.constant dense<0xFF800000> : vector<2x8xf32>
    %17 = vector.multi_reduction <maximumf>, %16, %cst_7 [2] : vector<2x8x8xf32> to vector<2x8xf32>
    %18 = vector.shape_cast %17 : vector<2x8xf32> to vector<2x8x1xf32>
    %19 = vector.broadcast %18 : vector<2x8x1xf32> to vector<2x8x8xf32>
    %20 = arith.subf %16, %19 : vector<2x8x8xf32>
    %21 = math.exp %20 : vector<2x8x8xf32>
    %cst_8 = arith.constant dense<0.000000e+00> : vector<2x8xf32>
    %22 = vector.multi_reduction <add>, %21, %cst_8 [2] : vector<2x8x8xf32> to vector<2x8xf32>
    %23 = vector.shape_cast %22 : vector<2x8xf32> to vector<2x8x1xf32>
    %cst_9 = arith.constant 1.000000e+00 : f32
    %24 = vector.broadcast %cst_9 : f32 to vector<2x8x1xf32>
    %25 = arith.divf %24, %23 : vector<2x8x1xf32>
    %cst_10 = arith.constant 0.176776692 : f32
    %26 = vector.broadcast %cst_10 : f32 to vector<2x8x1xf32>
    %27 = arith.mulf %25, %26 : vector<2x8x1xf32>
    %28 = vector.broadcast %27 : vector<2x8x1xf32> to vector<2x8x8xf32>
    %29 = arith.mulf %21, %28 : vector<2x8x8xf32>
    %30 = arith.truncf %29 : vector<2x8x8xf32> to vector<2x8x8xbf16>
    %31 = arith.truncf %13 : vector<2x8x32xf32> to vector<2x8x32xbf16>
    "tpu.trace_start"() <{level = 10 : i32, message = "bqk,bkd->bqd"}> : () -> ()
    %cst_11 = arith.constant dense<0.000000e+00> : vector<2x8x32xf32>
    %32 = tpu.matmul %30, %31, %cst_11 {dimension_numbers = #tpu.dot_dimension_numbers<[2], [1], [1], [2], [0, 0, 0, 1, 1, 2], [0], [0]>} : vector<2x8x8xbf16>, vector<2x8x32xbf16>, vector<2x8x32xf32> -> vector<2x8x32xf32>
    "tpu.trace_stop"() : () -> ()
    %c0_12 = arith.constant 0 : index
    %c0_13 = arith.constant 0 : index
    %c0_14 = arith.constant 0 : index
    %33 = vector.load %arg4[%c0_12, %c0_13, %c0_14] : memref<2x8x32xf32, #tpu.memory_space<vmem>>, vector<2x8x32xf32>
    tpu.vector_store %arg4[%c0_12, %c0_13, %c0_14], %32 {strides = array<i32>} : memref<2x8x32xf32, #tpu.memory_space<vmem>>, vector<2x8x32xf32>,
    return
  }
  func.func @transform_0(%arg0: i32) -> (i32, i32, i32) {
    %c0_i32 = arith.constant 0 : i32
    %c0_i32_0 = arith.constant 0 : i32
    %c0_i32_1 = arith.constant 0 : i32
    return %arg0, %c0_i32, %c0_i32_0 : i32, i32, i32
  }
  func.func @transform_1(%arg0: i32) -> (i32, i32) {
    %c0_i32 = arith.constant 0 : i32
    %c0_i32_0 = arith.constant 0 : i32
    %c0_i32_1 = arith.constant 0 : i32
    return %c0_i32, %c0_i32_0 : i32, i32
  }
  func.func @transform_2(%arg0: i32) -> (i32, i32) {
    %c0_i32 = arith.constant 0 : i32
    %c0_i32_0 = arith.constant 0 : i32
    %c0_i32_1 = arith.constant 0 : i32
    return %c0_i32, %c0_i32_0 : i32, i32
  }
  func.func @transform_3(%arg0: i32) -> (i32, i32, i32) {
    %c0_i32 = arith.constant 0 : i32
    %c0_i32_0 = arith.constant 0 : i32
    %c0_i32_1 = arith.constant 0 : i32
    return %arg0, %c0_i32, %c0_i32_0 : i32, i32, i32
  }
}

</mosaic_0001>

<bundles_post_ra>
// kernel: tpu_custom_call.1
= control target key start
LH: loop header
LB: loop body
LE: loop exit
PB: predicated region body
PF: predicated region fallthrough
CT: control target
= control target key end

     0   :  { %8 = vsyncpa [#allocation3], 0  ;;  %s516_s0 = inlined_call_operand.hbm [shape: f32[2,8,32], index: 0, kind: input, shape index: {}]   ;;  %s517_s1 = inlined_call_operand.hbm [shape: bf16[32,288], index: 1, kind: input, shape index: {}]   ;;  %s518_s2 = inlined_call_operand.hbm [shape: f32[1,288], index: 2, kind: input, shape index: {}]   ;;  %s519_s3 = inlined_call_operand.hbm [shape: f32[2,8,32], index: 3, kind: output, shape index: {}]  }
   0x1   :  { %9 = vsyncpa [#allocation6], 0  ;;  %s28_s14 = sshll.u32 %s517_s1, 4  ;;  %s29_s14 = int_to_ptr.hbm [resolvable:$true] %s28_s14 }
   0x2   :  { %10 = vsyncpa [#allocation4], 0  ;;  %s459_s15 = smov [#allocation5]   ;;  %s15_s19 = sshll.u32 %s516_s0, 4  ;;  %s16_s19 = int_to_ptr.hbm [resolvable:$true] %s15_s19 }
   0x3   :  { %s30_s16 = sshll.u32 %s459_s15, 4  ;;  %s460_s20 = smov 192   ;;  %s31_s16 = int_to_ptr.vmem [resolvable:$true] %s30_s16 }
   0x4   :  { %s461_s21 = smov 12   ;;  %s462_s22 = smov [#allocation2]  }
   0x5   :  { %36 = dma.hbm_to_vmem [thread:$0]  %s29_s14, 768, %s31_s16, [#allocation6], %s460_s20, %s460_s20, %s461_s21  }
   0x6   :  { %s17_s23 = sshll.u32 %s462_s22, 4  ;;  %s463_s24 = smov 128   ;;  %s18_s23 = int_to_ptr.vmem [resolvable:$true] %s17_s23 }
   0x7   :  { %s464_s25 = smov 8   ;;  %s42_s27 = sshll.u32 %s518_s2, 4  ;;  %s43_s27 = int_to_ptr.hbm [resolvable:$true] %s42_s27 }
   0x8   :  { %23 = dma.hbm_to_vmem [thread:$0]  %s16_s19, 256, %s18_s23, [#allocation3], %s463_s24, %s463_s24, %s464_s25  }
   0x9   :  { %s465_s28 = smov [#allocation7]  }
   0xa   :  { %s44_s0 = sshll.u32 %s465_s28, 4  ;;  %s45_s0 = int_to_ptr.vmem [resolvable:$true] %s44_s0 }
   0xb   :  { %47 = dma.hbm_to_vmem [thread:$0]  %s43_s27, 48, %s45_s0, [#allocation6]  }
   0xc   :  { %453 = dma.done.wait [#allocation3], 256  }
   0xd   :  { %454 = vsyncadd [#allocation3], 4294967040 }
   0xe   :  { %455 = dma.done.wait [#allocation6], 816  }
   0xf   :  { %456 = vsyncadd [#allocation6], 4294966480  ;;  %v338_v0 = vld [vmem:[#allocation5 + $0x1c] sm:$0xf]  ;;  %v322_v1 = vld [vmem:[#allocation5 + $0x24] sm:$0xf0] }
  0x10   :  { %v335_v2 = vld [vmem:[#allocation5 + $0x4] sm:$0xf]  ;;  %v325_v3 = vor.u32 %v338_v0, %v322_v1  ;;  %v310_v4 = vld [vmem:[#allocation5 + $0xc] sm:$0xf0]  ;;  %v320_v5 = vld [vmem:[#allocation5 + $0x18] sm:$0xf] }
  0x11   :  { %v339_v6 = vld [vmem:[#allocation5 + $0x20] sm:$0xf0]  ;;  %v308_v8 = vld [vmem:[#allocation5] sm:$0xf]  ;;  %v313_v9 = vor.u32 %v335_v2, %v310_v4  ;;  %v61_v10 = vld [vmem:[#allocation2] sm:$0xff]  ;;  %vm112_vm0 = vcmask 261120  }
  0x12   :  { %v321_v7 = vor.u32 %v339_v6, %v320_v5  ;;  %136 = vmatpush.bf16.msra.mxu1 %v325_v3  ;;  %v62_v11 = vld [vmem:[#allocation2 + $0x8] sm:$0xff]  ;;  %v336_v12 = vld [vmem:[#allocation5 + $0x8] sm:$0xf0]  ;;  %v72_v15 = vld [vmem:[#allocation7] sm:$0x7]  ;;  %vm188_vm1 = vcmask 64512  }
  0x13   :  { %v309_v13 = vor.u32 %v336_v12, %v308_v8  ;;  %v63_v14 = vpack.c.bf16 %v62_v11, %v61_v10  ;;  %v75_v16 = vperm.slane %v72_v15, 1  ;;  %v74_v18 = vperm.slane %v72_v15, 0  ;;  %v328_v30 = vld [vmem:[#allocation5 + $0x20] sm:$0xf]  ;;  %v340_v31 = vld [vmem:[#allocation5 + $0x28] sm:$0xf0] }
  0x14   :  { %122 = vmatpush.bf16.msra.mxu0 %v321_v7  ;;  %v316_v32 = vld [vmem:[#allocation5 + $0x8] sm:$0xf]  ;;  %v329_v33 = vor.u32 %v340_v31, %v328_v30  ;;  %v337_v34 = vld [vmem:[#allocation5 + $0x10] sm:$0xf0]  ;;  %v76_v53 = vperm.slane %v72_v15, 2  ;;  %vm248_vm2 = vcmask 1043456  }
  0x15   :  { %v317_v35 = vor.u32 %v337_v34, %v316_v32  ;;  %s466_s2 = smov [#allocation8]   ;;  %s292_s5 = sshll.u32 %s519_s3, 4  ;;  %s293_s5 = int_to_ptr.hbm [resolvable:$true] %s292_s5 }
  0x16   :  { %137 = vmatpush.bf16.msra.mxu1 %v313_v9  ;;  %150 = vmatpush.bf16.msra.mxu2 %v329_v33  ;;  %s290_s29 = sshll.u32 %s466_s2, 4  ;;  %s291_s29 = int_to_ptr.vmem [resolvable:$true] %s290_s29 }
  0x18   :  { %123 = vmatpush.bf16.msra.mxu0 %v309_v13 }
  0x19   :  { %331 = vmatmul.msk.bf16.vlgmr.msra.gmra.mxu1 %vm112_vm0, %v63_v14 }
  0x1a   :  { %151 = vmatpush.bf16.msra.mxu2 %v317_v35 }
  0x1b   :  { %330 = vmatmul.msk.bf16.vlgmr.msra.gmra.mxu0 %vm112_vm0, %v63_v14 }
  0x1d   :  { %332 = vmatmul.msk.bf16.vlgmr.msra.gmra.mxu2 %vm112_vm0, %v63_v14 }
  0x96   :  { %v139_v17 = vpop.f32.mrf.mxu1 }
  0x97   :  { %v140_v19 = vadd.f32 %v139_v17, %v75_v16 }
  0x98   :  { %v125_v20 = vpop.f32.mrf.mxu0 }
  0x99   :  { %v160_v21 = vpack.c.bf16 %v140_v19, %v140_v19  ;;  %v126_v22 = vadd.f32 %v125_v20, %v74_v18 }
  0x9b   :  { %169 = vmatpush.bf16.xpose.msra.mxu3 %v160_v21  ;;  %v158_v23 = vpack.c.bf16 %v126_v22, %v126_v22 }
  0x9e   :  { %v141_v24 = vpop.f32.mrf.mxu1 }
  0x9f   :  { %v142_v25 = vadd.f32 %v141_v24, %v75_v16 }
  0xa0   :  { %v127_v27 = vpop.f32.mrf.mxu0  ;;  %v153_v52 = vpop.f32.mrf.mxu2 }
  0xa1   :  { %v161_v26 = vpack.c.bf16 %v142_v25, %v142_v25  ;;  %v128_v28 = vadd.f32 %v127_v27, %v74_v18  ;;  %v154_v54 = vadd.f32 %v153_v52, %v76_v53 }
  0xa2   :  { %170 = vmatmul.bf16.vlgmr.msra.gmra.mxu3 %v158_v23 }
  0xa3   :  { %182 = vmatpush.bf16.xpose.msrb.mxu0 %v161_v26  ;;  %v159_v29 = vpack.c.bf16 %v128_v28, %v128_v28  ;;  %v243_v56 = vpack.c.bf16 %v154_v54, %v154_v54 }
  0xa5   :  { %v250_v59 = vsel %vm248_vm2, %v243_v56, 0 }
  0xa6   :  { %259 = vmatpush.bf16.msrb.mxu1 %v250_v59 }
  0xa8   :  { %v155_v55 = vpop.f32.mrf.mxu2 }
  0xa9   :  { %v156_v57 = vadd.f32 %v155_v55, %v76_v53 }
  0xaa   :  { %183 = vmatmul.bf16.vlgmr.msrb.gmra.mxu0 %v159_v29 }
  0xab   :  { %v244_v58 = vpack.c.bf16 %v156_v57, %v156_v57 }
  0xad   :  { %v269_v60 = vsel %vm248_vm2, %v244_v58, 0 }
  0xae   :  { %278 = vmatpush.bf16.msrb.mxu2 %v269_v60 }
 0x125   :  { %v171_v36 = vpop.f32.mrf.mxu3 }
 0x126   :  { %v189_v41 = vsel %vm188_vm1, %v171_v36, -inf }
 0x127   :  { %v184_v37 = vpop.f32.mrf.mxu0 }
 0x128   :  { %v192_v38 = vsel %vm188_vm1, %v184_v37, -inf }
 0x129   :  { %193 = vmax.xlane.f32.xlu0 %v192_v38 }
 0x12d   :  { %v173_v39 = vpop.f32.mrf.mxu3 }
 0x12f   :  { %v186_v40 = vpop.f32.mrf.mxu0 }
 0x131   :  { %190 = vmax.xlane.f32.xlu0 %v189_v41 }
 0x19c   :  { %v194_v42 = vpop.xlane.xlu0 %193 }
 0x19d   :  { %v196_v43 = vsub.f32 %v184_v37, %v194_v42 }
 0x19f   :  { %v199_v44 = vmul.f32 1.442695, %v196_v43 }
 0x1a1   :  { %349 = vpow2.f32 %v199_v44 }
 0x1a4   :  { %v191_v45 = vpop.xlane.xlu0 %190 }
 0x1a5   :  { %v195_v46 = vsub.f32 %v171_v36, %v191_v45 }
 0x1a7   :  { %v350_v47 = vpop.eup %349  ;;  %v197_v48 = vmul.f32 1.442695, %v195_v46 }
 0x1a8   :  { %v204_v49 = vsel %vm188_vm1, %v350_v47, 0.0 }
 0x1a9   :  { %351 = vpow2.f32 %v197_v48  ;;  %205 = vadd.xlane.f32.xlu1 %v204_v49 }
 0x1af   :  { %v352_v50 = vpop.eup %351 }
 0x1b0   :  { %v201_v51 = vsel %vm188_vm1, %v352_v50, 0.0 }
 0x1b1   :  { %202 = vadd.xlane.f32.xlu1 %v201_v51 }
 0x21c   :  { %v206_v61 = vpop.xlane.xlu1 %205 }
 0x21d   :  { %353 = vrcp.f32 %v206_v61  ;;  %v233_v2 = vand.u32 2147483648, %v206_v61  ;;  %v231_v4 = vand.u32 2147483647, %v206_v61  ;;  %vm227_vm4 = vweird.f32 %v206_v61 }
 0x21f   :  { %v234_v7 = vor.u32 1.1754944e-38, %v233_v2  ;;  %vm232_vm6 = vcmp.eq.f32.partialorder %v231_v4, 8.507059e+37 }
 0x223   :  { %v354_v62 = vpop.eup %353 }
 0x224   :  { %v223_v63 = vmul.f32 %v354_v62, %v206_v61  ;;  %v203_v0 = vpop.xlane.xlu1 %202  ;;  %vm228_vm3 = vweird.f32 %v354_v62 }
 0x225   :  { %355 = vrcp.f32 %v203_v0  ;;  %vm229_vm5 = vmor %vm227_vm4, %vm228_vm3  ;;  %v218_v13 = vand.u32 2147483648, %v203_v0  ;;  %v216_v15 = vand.u32 2147483647, %v203_v0  ;;  %vm212_vm8 = vweird.f32 %v203_v0 }
 0x226   :  { %v224_v1 = vsub.f32 1.0, %v223_v63 }
 0x227   :  { %v219_v19 = vor.u32 1.1754944e-38, %v218_v13  ;;  %vm217_vm10 = vcmp.eq.f32.partialorder %v216_v15, 8.507059e+37 }
 0x228   :  { %v225_v3 = vmul.f32 %v354_v62, %v224_v1 }
 0x22a   :  { %v226_v5 = vadd.f32 %v354_v62, %v225_v3 }
 0x22b   :  { %v356_v6 = vpop.eup %355 }
 0x22c   :  { %v230_v8 = vsel %vm229_vm5, %v354_v62, %v226_v5  ;;  %v208_v9 = vmul.f32 %v356_v6, %v203_v0  ;;  %vm213_vm7 = vweird.f32 %v356_v6 }
 0x22d   :  { %v235_v10 = vsel %vm232_vm6, %v234_v7, %v230_v8  ;;  %vm214_vm9 = vmor %vm212_vm8, %vm213_vm7 }
 0x22e   :  { %v209_v11 = vsub.f32 1.0, %v208_v9  ;;  %v238_v12 = vmul.f32 0.17677669, %v235_v10 }
 0x230   :  { %v210_v14 = vmul.f32 %v356_v6, %v209_v11  ;;  %v240_v16 = vmul.f32 %v350_v47, %v238_v12 }
 0x232   :  { %v211_v17 = vadd.f32 %v356_v6, %v210_v14  ;;  %v242_v18 = vpack.c.bf16 %v240_v16, %v240_v16 }
 0x234   :  { %v215_v20 = vsel %vm214_vm9, %v356_v6, %v211_v17  ;;  %334 = vmatmul.msk.bf16.vlgmr.msrb.gmra.mxu2 %vm188_vm1, %v242_v18 }
 0x235   :  { %v220_v21 = vsel %vm217_vm10, %v219_v19, %v215_v20 }
 0x236   :  { %v237_v22 = vmul.f32 0.17677669, %v220_v21 }
 0x238   :  { %v239_v23 = vmul.f32 %v352_v50, %v237_v22 }
 0x23a   :  { %v241_v24 = vpack.c.bf16 %v239_v23, %v239_v23 }
 0x23c   :  { %333 = vmatmul.msk.bf16.vlgmr.msrb.gmra.mxu1 %vm188_vm1, %v241_v24 }
 0x2b7   :  { %v280_v25 = vpop.f32.mrf.mxu2 }
 0x2b8   :  { %285 = vst.msk [vmem:[#allocation8 + $0x8] sm:$0xff] %vm112_vm0, %v280_v25 }
 0x2b9   :  { %v261_v26 = vpop.f32.mrf.mxu1 }
 0x2ba   :  { %284 = vst.msk [vmem:[#allocation8] sm:$0xff] %vm112_vm0, %v261_v26 }
 0x2bb   :  { %298 = dma.vmem_to_hbm [thread:$0]  %s291_s29, 256, %s293_s5, [#allocation4], %s463_s24, %s463_s24, %s464_s25  }
 0x2bf   :  { %v282_v27 = vpop.f32.mrf.mxu2 }
 0x2c1   :  { %v263_v28 = vpop.f32.mrf.mxu1 }
 0x2c2   :  { %457 = dma.done.wait [#allocation4], 256  }
 0x2c3   :  { %458 = vsyncadd [#allocation4], 4294967040 }
 0x2c4   :  { %303 = vsyncpa [#allocation3], 1 }
 0x2c5   :  { %304 = vsyncpa [#allocation6], 1 }
 0x2c6   :  { %305 = vsyncpa [#allocation4], 1 }

</bundles_post_ra>
